<compile_context>
chip_gen: v5e
topology: v5e:2x2
jax: 0.10.0
libtpu: 0.0.40
codegen_flags: <defaults>
</compile_context>

<pallas_src>
import functools

import jax
import jax.numpy as jnp
from jax.experimental import pallas as pl
from jax.experimental.pallas import tpu as pltpu


def _round_up(n, m):
    return ((n + m - 1) // m) * m


def _moe_kernel(x_ref, wg_ref, wcat_ref, bproj_ref, o_ref, *, n_exps, d_out_pad):
    # x_ref:     (bb, D_in)            native dtype
    # wg_ref:    (D_in, E)             native dtype
    # wcat_ref:  (D_in, E*d_out_pad)   native dtype (experts concatenated on N)
    # bproj_ref: (E, d_out_pad)        f32 (precomputed bias_i @ W_i)
    # o_ref:     (bb, d_out_pad)
    x = x_ref[...]                                   # no up-cast: MXU takes bf16/f32 natively

    # --- gating: softmax(x @ w_gate) over experts, f32 accumulation ---
    logits = jnp.dot(x, wg_ref[...], preferred_element_type=jnp.float32)      # (bb, E)
    m = jnp.max(logits, axis=-1, keepdims=True)
    e = jnp.exp(logits - m)
    gates = e * pl.reciprocal(jnp.sum(e, axis=-1, keepdims=True), approx=True)  # (bb, E)

    # --- all experts in one lane-dense matmul: (bb, D_in) @ (D_in, E*D_out) ---
    y = jnp.dot(x, wcat_ref[...], preferred_element_type=jnp.float32)         # (bb, E*D)

    # --- gate-weighted reduce over experts (static unroll, 128-aligned slices) ---
    acc = jnp.zeros((x.shape[0], d_out_pad), dtype=jnp.float32)
    for i in range(n_exps):  # n_exps is small & static
        acc = acc + gates[:, i:i + 1] * y[:, i * d_out_pad:(i + 1) * d_out_pad]

    # --- bias correction folded into one tiny matmul: sum_i g_i * (b_i @ W_i) ---
    acc = acc - jnp.dot(gates, bproj_ref[...], preferred_element_type=jnp.float32)

    o_ref[...] = acc.astype(o_ref.dtype)


def moe_adaptor_forward(x, w_gate, biases, w_experts, *,
                        block_b=256, vmem_limit_bytes=None):
    """x: (B, D_in); w_gate: (D_in, E); biases: (E, D_in);
    w_experts: (E, D_in, D_out) (already transposed from torch's (D_out, D_in))."""
    B, D_in = x.shape
    E, _, D_out = w_experts.shape

    # Lane-dense output: pad the output feature dim to a multiple of 128.
    d_out_pad = _round_up(D_out, 128)
    w_e = w_experts
    if d_out_pad != D_out:
        w_e = jnp.pad(w_experts, ((0, 0), (0, 0), (0, d_out_pad - D_out)))

    # Precompute bias_i @ W_i  (E, d_out_pad) in f32 (tiny, done once in XLA).
    bias_proj = jnp.einsum('ed,edo->eo',
                           biases.astype(jnp.float32),
                           w_e.astype(jnp.float32))

    # Concatenate expert weights along the output dim: (D_in, E*d_out_pad).
    w_cat = jnp.transpose(w_e, (1, 0, 2)).reshape(D_in, E * d_out_pad).astype(x.dtype)
    w_gate = w_gate.astype(x.dtype)

    # Batch tile: big enough to feed the MXU; multiple of 8 sublanes; pad B.
    bb = min(_round_up(block_b, 8), _round_up(B, 8))
    B_pad = _round_up(B, bb)
    x_p = jnp.pad(x, ((0, B_pad - B), (0, 0))) if B_pad != B else x

    kernel = functools.partial(_moe_kernel, n_exps=E, d_out_pad=d_out_pad)

    out = pl.pallas_call(
        kernel,
        out_shape=jax.ShapeDtypeStruct((B_pad, d_out_pad), x.dtype),
        grid_spec=pltpu.PrefetchScalarGridSpec(
            num_scalar_prefetch=0,
            grid=(B_pad // bb,),
            in_specs=[
                pl.BlockSpec((bb, D_in), lambda i: (i, 0)),
                # Constant-index weight blocks: same block every step, so the
                # pipeline does not re-fetch them after the first iteration.
                pl.BlockSpec((D_in, E), lambda i: (0, 0)),
                pl.BlockSpec((D_in, E * d_out_pad), lambda i: (0, 0)),
                pl.BlockSpec((E, d_out_pad), lambda i: (0, 0)),
            ],
            out_specs=pl.BlockSpec((bb, d_out_pad), lambda i: (i, 0)),
        ),
        compiler_params=pltpu.CompilerParams(
            dimension_semantics=("parallel",),      # megacore-shardable batch axis
            vmem_limit_bytes=vmem_limit_bytes),
    )(x_p, w_gate, w_cat, bias_proj)

    return out[:B, :D_out]


def moe_adaptor_reference(x, w_gate, biases, w_experts):
    """Pure-JAX reference mirroring the PyTorch module."""
    gates = jax.nn.softmax(x @ w_gate, axis=-1)                      # (B, E)
    expert_outputs = jnp.stack(
        [(x - biases[i][None, :]) @ w_experts[i] for i in range(w_experts.shape[0])],
        axis=-2)                                                     # (B, E, D_out)
    return jnp.sum(gates[..., None] * expert_outputs, axis=-2)


if __name__ == "__main__":
    # Small shapes consistent with the module: layers = [D_in, D_out].
    B, D_in, D_out, n_exps = 64, 32, 16, 4

    key = jax.random.PRNGKey(0)
    kx, kw, kg, kb = jax.random.split(key, 4)

    x = jax.random.normal(kx, (B, D_in), dtype=jnp.float32)

    # PWLayer.lin.weight ~ N(0, 0.02), shape (D_out, D_in) per expert;
    # biases / w_gate initialized to zeros in torch — use small randoms here
    # to exercise the full code path.
    w_experts_t = 0.02 * jax.random.normal(kw, (n_exps, D_out, D_in), jnp.float32)
    w_experts = jnp.transpose(w_experts_t, (0, 2, 1))                # (E, D_in, D_out)
    w_gate = 0.02 * jax.random.normal(kg, (D_in, n_exps), jnp.float32)
    biases = 0.02 * jax.random.normal(kb, (n_exps, D_in), jnp.float32)

    # block_b=32 here just so the small demo exercises >1 grid step;
    # at production batch sizes leave the default (256).
    out = moe_adaptor_forward(x, w_gate, biases, w_experts, block_b=32)
    out = jax.block_until_ready(out)

    ref = moe_adaptor_reference(x, w_gate, biases, w_experts)
    assert out.shape == (B, D_out)
    # Tolerance loosened slightly vs 1e-5 for the approx (EUP) softmax reciprocal.
    assert jnp.allclose(out, ref, atol=1e-3, rtol=1e-3), "mismatch vs reference"

    print("KERNEL_OK")
</pallas_src>

<mosaic_0001>
module attributes {stable_mosaic.version = 11 : i64} {
  func.func @_moe_kernel(%arg0: i32, %arg1: memref<32x32xf32, #tpu.memory_space<vmem>>, %arg2: memref<32x4xf32, #tpu.memory_space<vmem>>, %arg3: memref<32x512xf32, #tpu.memory_space<vmem>>, %arg4: memref<4x128xf32, #tpu.memory_space<vmem>>, %arg5: memref<32x128xf32, #tpu.memory_space<vmem>>) attributes {dimension_semantics = [#tpu.dimension_semantics<parallel>], iteration_bounds = array<i64: 2>, scalar_prefetch = 0 : i64, scratch_operands = 0 : i64, tpu.core_type = #tpu.core_type<tc>, window_params = [{transform_indices = @transform_0, window_bounds = array<i64: 32, 32>}, {pipeline_mode = #tpu.pipeline_mode<synchronous>, transform_indices = @transform_1, window_bounds = array<i64: 32, 4>}, {pipeline_mode = #tpu.pipeline_mode<synchronous>, transform_indices = @transform_2, window_bounds = array<i64: 32, 512>}, {pipeline_mode = #tpu.pipeline_mode<synchronous>, transform_indices = @transform_3, window_bounds = array<i64: 4, 128>}, {transform_indices = @transform_4, window_bounds = array<i64: 32, 128>}]} {
    %c0 = arith.constant 0 : index
    %c0_0 = arith.constant 0 : index
    %0 = vector.load %arg1[%c0, %c0_0] : memref<32x32xf32, #tpu.memory_space<vmem>>, vector<32x32xf32>
    %c0_1 = arith.constant 0 : index
    %c0_2 = arith.constant 0 : index
    %1 = vector.load %arg2[%c0_1, %c0_2] : memref<32x4xf32, #tpu.memory_space<vmem>>, vector<32x4xf32>
    %cst = arith.constant dense<0.000000e+00> : vector<32x4xf32>
    %2 = tpu.matmul %0, %1, %cst {dimension_numbers = #tpu.dot_dimension_numbers<[1], [0], [0], [1], [0, 0, 1, 1], [], []>} : vector<32x32xf32>, vector<32x4xf32>, vector<32x4xf32> -> vector<32x4xf32>
    %cst_3 = arith.constant dense<0xFF800000> : vector<32xf32>
    %3 = vector.multi_reduction <maximumf>, %2, %cst_3 [1] : vector<32x4xf32> to vector<32xf32>
    %4 = vector.shape_cast %3 : vector<32xf32> to vector<32x1xf32>
    %5 = vector.broadcast %4 : vector<32x1xf32> to vector<32x4xf32>
    %6 = arith.subf %2, %5 : vector<32x4xf32>
    %7 = math.exp %6 : vector<32x4xf32>
    %cst_4 = arith.constant dense<0.000000e+00> : vector<32xf32>
    %8 = vector.multi_reduction <add>, %7, %cst_4 [1] : vector<32x4xf32> to vector<32xf32>
    %9 = vector.shape_cast %8 : vector<32xf32> to vector<32x1xf32>
    %10 = tpu.reciprocal %9 {approx = true} : vector<32x1xf32> -> vector<32x1xf32>
    %11 = vector.broadcast %10 : vector<32x1xf32> to vector<32x4xf32>
    %12 = arith.mulf %7, %11 : vector<32x4xf32>
    %c0_5 = arith.constant 0 : index
    %c0_6 = arith.constant 0 : index
    %13 = vector.load %arg3[%c0_5, %c0_6] : memref<32x512xf32, #tpu.memory_space<vmem>>, vector<32x512xf32>
    %cst_7 = arith.constant dense<0.000000e+00> : vector<32x512xf32>
    %14 = tpu.matmul %0, %13, %cst_7 {dimension_numbers = #tpu.dot_dimension_numbers<[1], [0], [0], [1], [0, 0, 1, 1], [], []>} : vector<32x32xf32>, vector<32x512xf32>, vector<32x512xf32> -> vector<32x512xf32>
    %cst_8 = arith.constant 0.000000e+00 : f32
    %15 = vector.broadcast %cst_8 : f32 to vector<32x128xf32>
    %16 = vector.extract_strided_slice %12 {offsets = [0, 0], sizes = [32, 1], strides = [1, 1]} : vector<32x4xf32> to vector<32x1xf32>
    %17 = vector.extract_strided_slice %14 {offsets = [0, 0], sizes = [32, 128], strides = [1, 1]} : vector<32x512xf32> to vector<32x128xf32>
    %18 = vector.broadcast %16 : vector<32x1xf32> to vector<32x128xf32>
    %19 = arith.mulf %18, %17 : vector<32x128xf32>
    %20 = arith.addf %15, %19 : vector<32x128xf32>
    %21 = vector.extract_strided_slice %12 {offsets = [0, 1], sizes = [32, 1], strides = [1, 1]} : vector<32x4xf32> to vector<32x1xf32>
    %22 = vector.extract_strided_slice %14 {offsets = [0, 128], sizes = [32, 128], strides = [1, 1]} : vector<32x512xf32> to vector<32x128xf32>
    %23 = vector.broadcast %21 : vector<32x1xf32> to vector<32x128xf32>
    %24 = arith.mulf %23, %22 : vector<32x128xf32>
    %25 = arith.addf %20, %24 : vector<32x128xf32>
    %26 = vector.extract_strided_slice %12 {offsets = [0, 2], sizes = [32, 1], strides = [1, 1]} : vector<32x4xf32> to vector<32x1xf32>
    %27 = vector.extract_strided_slice %14 {offsets = [0, 256], sizes = [32, 128], strides = [1, 1]} : vector<32x512xf32> to vector<32x128xf32>
    %28 = vector.broadcast %26 : vector<32x1xf32> to vector<32x128xf32>
    %29 = arith.mulf %28, %27 : vector<32x128xf32>
    %30 = arith.addf %25, %29 : vector<32x128xf32>
    %31 = vector.extract_strided_slice %12 {offsets = [0, 3], sizes = [32, 1], strides = [1, 1]} : vector<32x4xf32> to vector<32x1xf32>
    %32 = vector.extract_strided_slice %14 {offsets = [0, 384], sizes = [32, 128], strides = [1, 1]} : vector<32x512xf32> to vector<32x128xf32>
    %33 = vector.broadcast %31 : vector<32x1xf32> to vector<32x128xf32>
    %34 = arith.mulf %33, %32 : vector<32x128xf32>
    %35 = arith.addf %30, %34 : vector<32x128xf32>
    %c0_9 = arith.constant 0 : index
    %c0_10 = arith.constant 0 : index
    %36 = vector.load %arg4[%c0_9, %c0_10] : memref<4x128xf32, #tpu.memory_space<vmem>>, vector<4x128xf32>
    %cst_11 = arith.constant dense<0.000000e+00> : vector<32x128xf32>
    %37 = tpu.matmul %12, %36, %cst_11 {dimension_numbers = #tpu.dot_dimension_numbers<[1], [0], [0], [1], [0, 0, 1, 1], [], []>} : vector<32x4xf32>, vector<4x128xf32>, vector<32x128xf32> -> vector<32x128xf32>
    %38 = arith.subf %35, %37 : vector<32x128xf32>
    %c0_12 = arith.constant 0 : index
    %c0_13 = arith.constant 0 : index
    %39 = vector.load %arg5[%c0_12, %c0_13] : memref<32x128xf32, #tpu.memory_space<vmem>>, vector<32x128xf32>
    tpu.vector_store %arg5[%c0_12, %c0_13], %38 {strides = array<i32>} : memref<32x128xf32, #tpu.memory_space<vmem>>, vector<32x128xf32>,
    return
  }
  func.func @transform_0(%arg0: i32) -> (i32, i32) {
    %c0_i32 = arith.constant 0 : i32
    %c0_i32_0 = arith.constant 0 : i32
    return %arg0, %c0_i32 : i32, i32
  }
  func.func @transform_1(%arg0: i32) -> (i32, i32) {
    %c0_i32 = arith.constant 0 : i32
    %c0_i32_0 = arith.constant 0 : i32
    %c0_i32_1 = arith.constant 0 : i32
    return %c0_i32, %c0_i32_0 : i32, i32
  }
  func.func @transform_2(%arg0: i32) -> (i32, i32) {
    %c0_i32 = arith.constant 0 : i32
    %c0_i32_0 = arith.constant 0 : i32
    %c0_i32_1 = arith.constant 0 : i32
    return %c0_i32, %c0_i32_0 : i32, i32
  }
  func.func @transform_3(%arg0: i32) -> (i32, i32) {
    %c0_i32 = arith.constant 0 : i32
    %c0_i32_0 = arith.constant 0 : i32
    %c0_i32_1 = arith.constant 0 : i32
    return %c0_i32, %c0_i32_0 : i32, i32
  }
  func.func @transform_4(%arg0: i32) -> (i32, i32) {
    %c0_i32 = arith.constant 0 : i32
    %c0_i32_0 = arith.constant 0 : i32
    return %arg0, %c0_i32 : i32, i32
  }
}

</mosaic_0001>

<bundles_post_ra>
// kernel: tpu_custom_call.1
= control target key start
LH: loop header
LB: loop body
LE: loop exit
PB: predicated region body
PF: predicated region fallthrough
CT: control target
= control target key end

     0   :  { %9 = vsyncpa [#allocation3], 0  ;;  %s1135_s0 = inlined_call_operand.vmem [shape: f32[64,32], index: 0, kind: input, shape index: {}]   ;;  %s1136_s1 = inlined_call_operand.vmem [shape: f32[32,4], index: 1, kind: input, shape index: {}]   ;;  %s1137_s2 = inlined_call_operand.hbm [shape: f32[32,512], index: 2, kind: input, shape index: {}]   ;;  %s1138_s3 = inlined_call_operand.vmem [shape: f32[4,128], index: 3, kind: input, shape index: {}]   ;;  %s1139_s4 = inlined_call_operand.hbm [shape: f32[64,128], index: 4, kind: output, shape index: {}]  }
   0x1   :  { %10 = vsyncpa [#allocation4], 0 }
   0x2   :  { %12 = vsyncpa [#allocation4 + $0x1], 0  ;;  %s951_s15 = smov 0   ;;  %s953_s16 = smov 0  }
   0x3   :  { %s955_s17 = smov 0   ;;  %s957_s18 = smov 0  }
   0x4 LB: > { %s972_s19 = sadd.s32 4294967295, %s915_s18   ;;  %s683_s20 = sadd.s32 4294967294, %s915_s18   ;;  %s915_s18 = sphi %s957_s18, %s1145_s18   ;;  %s911_s17 = sphi %s955_s17, %s1144_s17   ;;  %s907_s16 = sphi %s953_s16, %s1143_s16   ;;  %s903_s15 = sphi %s951_s15, %s1142_s15  }
   0x5   : > { %s976_s21 = sadd.s32 1, %s915_s18   ;;  %s114_s22 = sadd.s32 1, %s911_s17 }
   0x6   : > { %s111_s23 = ssub.s32 %s915_s18, %s976_s21  ;;  %p124_p0 = scmp.ne.s32.totalorder %s911_s17, %s907_s16 }
   0x7   : > { %p112_p1 = scmp.eq.s32.totalorder %s111_s23, 0  ;;  %p125_p2 = scmp.eq.s32.totalorder %s972_s19, 1 }
   0x8   : > { %p130_p3 = scmp.ne.s32.totalorder %s907_s16, %s903_s15  ;;  %p131_p4 = scmp.eq.s32.totalorder %s683_s20, 1 }
   0x9   : > { %s987_s24 = scalar_select %p112_p1, %s911_s17, %s114_s22  }
   0xa   : > { %p989_p5 = por %p125_p2, %p124_p0  ;;  %p993_p6 = por %p131_p4, %p130_p3 }
   0xb   : > { %p684_p7 = scmp.ge.s32.totalorder %s915_s18, 1  ;;  %p138_p8 = scmp.lt.s32.totalorder %s915_s18, 3 }
   0xc   : > { %p745_p9 = scmp.eq.s32.totalorder %s972_s19, 0  ;;  %s152_s29 = sshll.u32 %s1137_s2, 4  ;;  %s153_s29 = int_to_ptr.hbm [resolvable:$true] %s152_s29 }
   0xd   : > { %p139_p10 = pnand %p684_p7, %p138_p8  ;;  %s917_s30 = smov [#allocation2]  }
   0xe   : > { %s154_s5 = sshll.u32 %s917_s30, 4  ;;  %s918_s6 = smov 512   ;;  %s155_s5 = int_to_ptr.vmem [resolvable:$true] %s154_s5 }
   0xf   : > { %p737_p11 = pneg %p139_p10  ;;  %s919_s7 = smov 32  }
  0x10   : > { %182 = sbr.rel (%p139_p10) target bundleno = 581 (0x245), region = 36 }
  0x11   : > { %p738_p12 = pnand %p745_p9, %p737_p11 }
  0x13   : > { %740 = dma.hbm_to_vmem [thread:$0]  (!%p738_p12), %s153_s29, 2048, %s155_s5, [#allocation3], %s918_s6, %s918_s6, %s919_s7  }
  0x15   : > { %894 = dma.done.wait (%p745_p9), [#allocation3], 2048  }
  0x16   : > { %896 = vsyncadd (%p745_p9), [#allocation3], 4294965248  ;;  %s690_s8 = sshll.u32 %s972_s19, 2  ;;  %v223_v0 = vld [vmem:[%s1136_s1 + $0x18] sm:$0xff]  ;;  %v222_v1 = vld [vmem:[%s1136_s1 + $0x10] sm:$0xff]  ;;  %vm224_vm0 = vcmask 261120  }
  0x17   : > { %p210_p13 = scmp.lt.s32.totalorder %s690_s8, 7  ;;  %249 = vmatpush.msra.mxu0 %v223_v0  ;;  %723 = vmatpush.msra.mxu2 %v223_v0  ;;  %v221_v2 = vld [vmem:[%s1136_s1 + $0x8] sm:$0xff]  ;;  %v220_v3 = vld [vmem:[%s1136_s1] sm:$0xff]  ;;  %vm266_vm1 = vcmask 31744   ;;  %v326_v24 = vld [vmem:[#allocation2 + $0x78] sm:$0xff]  ;;  %vm552_vm2 = vcmask 1043456  }
  0x18   : > { %v324_v16 = vld [vmem:[#allocation2 + $0x68] sm:$0xff]  ;;  %v323_v17 = vld [vmem:[#allocation2 + $0x60] sm:$0xff]  ;;  %v325_v27 = vld [vmem:[#allocation2 + $0x70] sm:$0xff]  ;;  %v920_v53 = vmov 3   ;;  %v921_v54 = vmov 2   ;;  %v922_v55 = vmov 0  }
  0x19   : > { %s1147_s8 = smov (!%p210_p13, %s690_s8), 7  ;;  %250 = vmatpush.msra.mxu0 %v222_v1  ;;  %724 = vmatpush.msra.mxu2 %v222_v1  ;;  %v320_v18 = vld [vmem:[#allocation2 + $0x48] sm:$0xff]  ;;  %v319_v19 = vld [vmem:[#allocation2 + $0x40] sm:$0xff]  ;;  %v322_v28 = vld [vmem:[#allocation2 + $0x58] sm:$0xff]  ;;  %v923_v1 = vmov 1   ;;  %s206_s6 = sand.u32 1, %s907_s16  }
  0x1a   : > { %s691_s9 = sshll.u32 %s1147_s8, 3  ;;  %727 = vmatpush.msra.mxu3 %v323_v17  ;;  %v316_v20 = vld [vmem:[#allocation2 + $0x28] sm:$0xff]  ;;  %339 = vmatpush.msra.mxu1 %v323_v17  ;;  %v315_v21 = vld [vmem:[#allocation2 + $0x20] sm:$0xff]  ;;  %v321_v30 = vld [vmem:[#allocation2 + $0x50] sm:$0xff]  ;;  %s689_s7 = sshll.u32 %s206_s6, 5 }
  0x1b   : > { %s213_s27 = scalar_lea.vmem %s1135_s0, %s691_s9  ;;  %251 = vmatpush.msra.mxu0 %v221_v2  ;;  %725 = vmatpush.msra.mxu2 %v221_v2  ;;  %v312_v22 = vld [vmem:[#allocation2 + $0x8] sm:$0xff]  ;;  %v311_v23 = vld [vmem:[#allocation2] sm:$0xff]  ;;  %v318_v31 = vld [vmem:[#allocation2 + $0x38] sm:$0xff]  ;;  %s1095_s8 = scalar_lea.vmem [#allocation5], %s689_s7 }
  0x1c   : > { %v1025_v4 = vld [vmem:[%s213_s27] sm:$0xff]  ;;  %v1027_v5 = vld [vmem:[%s213_s27 + $0x10] sm:$0xff]  ;;  %v1033_v6 = vld [vmem:[%s213_s27 + $0x8] sm:$0xff]  ;;  %728 = vmatpush.msra.mxu3 %v319_v19  ;;  %340 = vmatpush.msra.mxu1 %v319_v19  ;;  %s722_s9 = sshll.u32 %s972_s19, 5  ;;  %s606_s13 = sshll.u32 %s1095_s8, 4  ;;  %s607_s13 = int_to_ptr.vmem [resolvable:$true] %s606_s13 }
  0x1d   : > { %252 = vmatpush.msra.mxu0 %v220_v3  ;;  %726 = vmatpush.msra.mxu2 %v220_v3  ;;  %v1035_v7 = vld [vmem:[%s213_s27 + $0x18] sm:$0xff]  ;;  %v317_v32 = vld [vmem:[#allocation2 + $0x30] sm:$0xff]  ;;  %v543_v52 = vld [vmem:[%s1138_s3] sm:$0xf]  ;;  %s605_s12 = scalar_lea.hbm %s1139_s4, %s722_s9  ;;  %s594_s19 = scalar_lea.sflag [#allocation4], %s206_s6 }
  0x1e   : > { %692 = vmatmul.msk.f32.vlgmr.msra.gmra.mxu0 %vm224_vm0, %v1025_v4  ;;  %694 = vmatmul.msk.f32.vlgmr.msra.gmra.mxu2 %vm224_vm0, %v1027_v5  ;;  %v314_v34 = vld [vmem:[#allocation2 + $0x18] sm:$0xff]  ;;  %v313_v36 = vld [vmem:[#allocation2 + $0x10] sm:$0xff]  ;;  %s608_s14 = sshll.u32 %s605_s12, 4  ;;  %s869_s28 = scalar_lea.hbm %s1139_s4, 64  ;;  %s609_s14 = int_to_ptr.hbm [resolvable:$true] %s608_s14 }
  0x1f   : > { %368 = vmatpush.msrb.mxu2 %v324_v16  ;;  %729 = vmatpush.msra.mxu3 %v315_v21  ;;  %s863_s20 = sshra.s32 %s609_s14, 4  ;;  %s864_s20 = int_to_ptr.hbm [resolvable:$true] %s863_s20 }
  0x20   : > { %341 = vmatpush.msra.mxu1 %v315_v21  ;;  %426 = vmatpush.msrb.mxu0 %v326_v24  ;;  %s865_s22 = scalar_lea.hbm %s864_s20, 32  ;;  %p870_p3 = scmp.lt.s32.totalorder %s864_s20, %s1139_s4 }
  0x21   : > { %369 = vmatpush.msrb.mxu2 %v320_v18  ;;  %730 = vmatpush.msra.mxu3 %v311_v23  ;;  %p866_p0 = scmp.ne.s32.totalorder %s864_s20, %s865_s22  ;;  %p871_p4 = scmp.lt.s32.totalorder %s869_s28, %s865_s22 }
  0x22   : > { %698 = vmatmul.msk.f32.vlgmr.msra.gmra.mxu3 %vm224_vm0, %v1027_v5  ;;  %342 = vmatpush.msra.mxu1 %v311_v23 }
  0x23   : > { %370 = vmatpush.msrb.mxu2 %v316_v20  ;;  %397 = vmatpush.msrb.mxu3 %v325_v27  ;;  %p867_p1 = pnand %p866_p0, %p989_p5  ;;  %p872_p7 = por %p871_p4, %p870_p3 }
  0x24   : > { %696 = vmatmul.msk.f32.vlgmr.msra.gmra.mxu1 %vm224_vm0, %v1025_v4  ;;  %427 = vmatpush.msrb.mxu0 %v322_v28 }
  0x25   : > { %371 = vmatpush.msrb.mxu2 %v312_v22  ;;  %398 = vmatpush.msrb.mxu3 %v321_v30  ;;  %p868_p2 = pneg %p867_p1 }
  0x26   : > { %693 = vmatmul.msk.f32.gmra.mxu0 %vm224_vm0, %v1033_v6  ;;  %695 = vmatmul.msk.f32.gmra.mxu2 %vm224_vm0, %v1035_v7 }
  0x27   : > { %428 = vmatpush.msrb.mxu0 %v318_v31  ;;  %399 = vmatpush.msrb.mxu3 %v317_v32  ;;  %p873_p8 = pnand %p872_p7, %p868_p2 }
  0x28   : > { %712 = vmatpush.msk.msrb.mxu1 %vm552_vm2, %v543_v52  ;;  %792 = vset.pattern.permute.xlu1 %v920_v53 }
  0x29   : > { %429 = vmatpush.msrb.mxu0 %v314_v34  ;;  %400 = vmatpush.msrb.mxu3 %v313_v36 }
  0x2a   : > { %699 = vmatmul.msk.f32.gmra.mxu3 %vm224_vm0, %v1035_v7  ;;  %791 = vset.pattern.permute.xlu0 %v921_v54 }
  0x2b   : > { %789 = vset.pattern.permute.xlu2 %v922_v55 }
  0x2c   : > { %697 = vmatmul.msk.f32.gmra.mxu1 %vm224_vm0, %v1033_v6 }
  0x2e   : > { %700 = vmatmul.msk.f32.vlgmr.msrb.gmra.mxu2 %vm224_vm0, %v1025_v4  ;;  %708 = vmatmul.msk.f32.vlgmr.msrb.gmra.mxu0 %vm224_vm0, %v1025_v4 }
  0x32   : > { %704 = vmatmul.msk.f32.vlgmr.msrb.gmra.mxu3 %vm224_vm0, %v1025_v4 }
  0x36   : > { %701 = vmatmul.msk.f32.gmra.mxu2 %vm224_vm0, %v1033_v6  ;;  %709 = vmatmul.msk.f32.gmra.mxu0 %vm224_vm0, %v1033_v6 }
  0x3a   : > { %705 = vmatmul.msk.f32.gmra.mxu3 %vm224_vm0, %v1033_v6 }
  0x3e   : > { %702 = vmatmul.msk.f32.gmra.mxu2 %vm224_vm0, %v1027_v5  ;;  %710 = vmatmul.msk.f32.gmra.mxu0 %vm224_vm0, %v1027_v5 }
  0x42   : > { %706 = vmatmul.msk.f32.gmra.mxu3 %vm224_vm0, %v1027_v5 }
  0x46   : > { %703 = vmatmul.msk.f32.gmra.mxu2 %vm224_vm0, %v1035_v7  ;;  %711 = vmatmul.msk.f32.gmra.mxu0 %vm224_vm0, %v1035_v7 }
  0x4a   : > { %707 = vmatmul.msk.f32.gmra.mxu3 %vm224_vm0, %v1035_v7 }
  0x9b   : > { %v254_v8 = vpop.f32.mrf.mxu0 }
  0x9c   : > { %v267_v9 = vsel %vm266_vm1, %v254_v8, -inf }
  0x9d   : > { %268 = vmax.xlane.f32.xlu0 %v267_v9 }
  0xa1   : > { %v260_v10 = vpop.f32.mrf.mxu2  ;;  %v344_v9 = vpop.f32.mrf.mxu1 }
  0xa2   : > { %v273_v11 = vsel %vm266_vm1, %v260_v10, -inf }
  0xa3   : > { %274 = vmax.xlane.f32.xlu1 %v273_v11  ;;  %v257_v12 = vpop.f32.mrf.mxu0 }
  0xa4   : > { %v270_v13 = vsel %vm266_vm1, %v257_v12, -inf }
  0xa5   : > { %271 = vmax.xlane.f32.xlu0 %v270_v13  ;;  %v350_v6 = vpop.f32.mrf.mxu3 }
  0xa9   : > { %v1044_v14 = vpop.f32.mrf.mxu2 }
  0xaa   : > { %v276_v15 = vsel %vm266_vm1, %v1044_v14, -inf }
  0xab   : > { %277 = vmax.xlane.f32.xlu1 %v276_v15  ;;  %v431_v21 = vpop.f32.mrf.mxu0 }
  0xb1   : > { %v373_v11 = vpop.f32.mrf.mxu2 }
  0xb3   : > { %v434_v31 = vpop.f32.mrf.mxu0 }
 0x110   : > { %v269_v25 = vpop.xlane.xlu0 %268 }
 0x111   : > { %v279_v26 = vsub.f32 %v254_v8, %v269_v25  ;;  %v353_v8 = vpop.f32.mrf.mxu3 }
 0x113   : > { %v283_v29 = vmul.f32 1.442695, %v279_v26 }
 0x115   : > { %803 = vpow2.f32 %v283_v29  ;;  %v376_v29 = vpop.f32.mrf.mxu2 }
 0x116   : > { %v275_v33 = vpop.xlane.xlu1 %274 }
 0x117   : > { %v281_v35 = vsub.f32 %v260_v10, %v275_v33 }
 0x118   : > { %v272_v37 = vpop.xlane.xlu0 %271 }
 0x119   : > { %v287_v38 = vmul.f32 1.442695, %v281_v35  ;;  %v280_v39 = vsub.f32 %v257_v12, %v272_v37  ;;  %v402_v13 = vpop.f32.mrf.mxu3 }
 0x11b   : > { %v804_v40 = vpop.eup %803  ;;  %805 = vpow2.f32 %v287_v38  ;;  %v285_v41 = vmul.f32 1.442695, %v280_v39 }
 0x11c   : > { %v291_v42 = vsel %vm266_vm1, %v804_v40, 0.0 }
 0x11d   : > { %807 = vpow2.f32 %v285_v41  ;;  %292 = vadd.xlane.f32.xlu2 %v291_v42  ;;  %v379_v35 = vpop.f32.mrf.mxu2  ;;  %v437_v41 = vpop.f32.mrf.mxu0 }
 0x11e   : > { %v278_v43 = vpop.xlane.xlu1 %277 }
 0x11f   : > { %v282_v44 = vsub.f32 %v1044_v14, %v278_v43  ;;  %v347_v14 = vpop.f32.mrf.mxu1 }
 0x121   : > { %v806_v45 = vpop.eup %805  ;;  %v289_v46 = vmul.f32 1.442695, %v282_v44  ;;  %v405_v30 = vpop.f32.mrf.mxu3 }
 0x122   : > { %v297_v47 = vsel %vm266_vm1, %v806_v45, 0.0 }
 0x123   : > { %v808_v48 = vpop.eup %807  ;;  %809 = vpow2.f32 %v289_v46  ;;  %298 = vadd.xlane.f32.xlu0 %v297_v47 }
 0x124   : > { %v294_v49 = vsel %vm266_vm1, %v808_v48, 0.0 }
 0x125   : > { %295 = vadd.xlane.f32.xlu2 %v294_v49 }
 0x129   : > { %v810_v50 = vpop.eup %809  ;;  %v408_v38 = vpop.f32.mrf.mxu3 }
 0x12a   : > { %v300_v51 = vsel %vm266_vm1, %v810_v50, 0.0 }
 0x12b   : > { %301 = vadd.xlane.f32.xlu1 %v300_v51 }
 0x190   : > { %v293_v56 = vpop.xlane.xlu2 %292 }
 0x191   : > { %811 = vrcp.f32 %v293_v56 }
 0x196   : > { %v299_v58 = vpop.xlane.xlu0 %298 }
 0x197   : > { %v812_v57 = vpop.eup %811 }
 0x198   : > { %v307_v59 = vmul.f32 %v812_v57, %v804_v40  ;;  %v296_v60 = vpop.xlane.xlu2 %295 }
 0x199   : > { %813 = vrcp.f32 %v296_v60 }
 0x19a   : > { %815 = vrcp.f32 %v299_v58  ;;  %520 = vperm.xlu1 %792, %v307_v59   ;;  %713 = vmatmul.msk.f32.vlgmr.msrb.gmra.mxu1 %vm266_vm1, %v307_v59  ;;  %v382_v58 = vpop.f32.mrf.mxu2 }
 0x19b   : > { %496 = vperm.xlu0 %791, %v307_v59   ;;  %445 = vperm.xlu2 %789, %v307_v59  }
 0x19e   : > { %v302_v2 = vpop.xlane.xlu1 %301 }
 0x19f   : > { %v814_v61 = vpop.eup %813  ;;  %817 = vrcp.f32 %v302_v2 }
 0x1a0   : > { %v816_v62 = vpop.eup %815  ;;  %v308_v63 = vmul.f32 %v814_v61, %v808_v48 }
 0x1a1   : > { %v309_v0 = vmul.f32 %v816_v62, %v806_v45 }
 0x1a2   : > { %793 = vset.pattern.permute.xlu1 %v922_v55  ;;  %714 = vmatmul.msk.f32.gmra.mxu1 %vm266_vm1, %v308_v63 }
 0x1a3   : > { %795 = vset.pattern.permute.xlu0 %v922_v55  ;;  %790 = vset.pattern.permute.xlu2 %v923_v1 }
 0x1a4   : > { %472 = vperm.xlu2 %790, %v307_v59   ;;  %450 = vperm.xlu0 %795, %v308_v63  }
 0x1a5   : > { %455 = vperm.xlu1 %793, %v309_v0   ;;  %v818_v3 = vpop.eup %817 }
 0x1a6   : > { %v310_v4 = vmul.f32 %v818_v3, %v810_v50 }
 0x1aa   : > { %715 = vmatmul.msk.f32.gmra.mxu1 %vm266_vm1, %v309_v0 }
 0x1ac   : > { %800 = vset.pattern.permute.xlu0 %v920_v53  ;;  %480 = vperm.xlu2 %790, %v309_v0  }
 0x1ad   : > { %794 = vset.pattern.permute.xlu1 %v921_v54  ;;  %524 = vperm.xlu0 %800, %v308_v63  }
 0x1ae   : > { %504 = vperm.xlu1 %794, %v309_v0  }
 0x1b2   : > { %716 = vmatmul.msk.f32.gmra.mxu1 %vm266_vm1, %v310_v4 }
 0x1b4   : > { %797 = vset.pattern.permute.xlu2 %v921_v54 }
 0x1b5   : > { %500 = vperm.xlu2 %797, %v308_v63  }
 0x1b6   : > { %796 = vset.pattern.permute.xlu1 %v923_v1  ;;  %v440_v1 = vpop.f32.mrf.mxu0 }
 0x1b7   : > { %476 = vperm.xlu1 %796, %v308_v63   ;;  %v411_v63 = vpop.f32.mrf.mxu3 }
 0x1bd   : > { %798 = vset.pattern.permute.xlu2 %v922_v55 }
 0x1be   : > { %460 = vperm.xlu2 %798, %v310_v4  }
 0x1bf   : > { %484 = vperm.xlu1 %796, %v310_v4  }
 0x1c6   : > { %799 = vset.pattern.permute.xlu2 %v921_v54 }
 0x1c7   : > { %802 = vset.pattern.permute.xlu1 %v920_v53  ;;  %508 = vperm.xlu2 %799, %v310_v4  }
 0x1c8   : > { %532 = vperm.xlu1 %802, %v310_v4  }
 0x1cf   : > { %801 = vset.pattern.permute.xlu2 %v920_v53 }
 0x1d0   : > { %528 = vperm.xlu2 %801, %v309_v0  }
 0x1f5   : > { %v446_v5 = vpop.permute.xlu2 %445 }
 0x1f6   : > { %v463_v17 = vmul.f32 %v446_v5, %v344_v9 }
 0x1fe   : > { %v473_v7 = vpop.permute.xlu2 %472 }
 0x1ff   : > { %v487_v12 = vmul.f32 %v473_v7, %v373_v11 }
 0x201   : > { %v491_v20 = vadd.f32 %v487_v12, %v463_v17 }
 0x206   : > { %v481_v10 = vpop.permute.xlu2 %480 }
 0x207   : > { %v489_v39 = vmul.f32 %v481_v10, %v379_v35 }
 0x20c   : > { %v521_v15 = vpop.permute.xlu1 %520 }
 0x20d   : > { %v497_v16 = vpop.permute.xlu0 %496  ;;  %v535_v23 = vmul.f32 %v521_v15, %v431_v21 }
 0x20e   : > { %v511_v18 = vmul.f32 %v497_v16, %v402_v13 }
 0x20f   : > { %v501_v19 = vpop.permute.xlu2 %500 }
 0x210   : > { %v515_v22 = vadd.f32 %v511_v18, %v491_v20  ;;  %v512_v50 = vmul.f32 %v501_v19, %v405_v30 }
 0x212   : > { %v539_v24 = vadd.f32 %v535_v23, %v515_v22 }
 0x216   : > { %v451_v33 = vpop.permute.xlu0 %450 }
 0x217   : > { %v456_v25 = vpop.permute.xlu1 %455  ;;  %v573_v26 = vpop.f32.mrf.mxu1  ;;  %v464_v44 = vmul.f32 %v451_v33, %v347_v14 }
 0x218   : > { %v585_v27 = vsub.f32 %v539_v24, %v573_v26  ;;  %v461_v28 = vpop.permute.xlu2 %460  ;;  %v465_v37 = vmul.f32 %v456_v25, %v350_v6 }
 0x219   : > { %v466_v62 = vmul.f32 %v461_v28, %v353_v8 }
 0x21a   : > { %589 = vst [vmem:[%s1095_s8] sm:$0xff] %v585_v27  ;;  %v493_v42 = vadd.f32 %v489_v39, %v465_v37 }
 0x21f   : > { %v576_v36 = vpop.f32.mrf.mxu1  ;;  %v525_v48 = vpop.permute.xlu0 %524 }
 0x220   : > { %v505_v32 = vpop.permute.xlu1 %504  ;;  %v536_v53 = vmul.f32 %v525_v48, %v434_v31 }
 0x221   : > { %v509_v34 = vpop.permute.xlu2 %508  ;;  %v513_v40 = vmul.f32 %v505_v32, %v408_v38 }
 0x222   : > { %v514_v2 = vmul.f32 %v509_v34, %v411_v63 }
 0x223   : > { %v517_v47 = vadd.f32 %v513_v40, %v493_v42 }
 0x227   : > { %v579_v55 = vpop.f32.mrf.mxu1 }
 0x229   : > { %v477_v43 = vpop.permute.xlu1 %476 }
 0x22a   : > { %v488_v45 = vmul.f32 %v477_v43, %v376_v29  ;;  %v529_v46 = vpop.permute.xlu2 %528 }
 0x22b   : > { %v537_v49 = vmul.f32 %v529_v46, %v437_v41 }
 0x22c   : > { %v492_v51 = vadd.f32 %v488_v45, %v464_v44 }
 0x22d   : > { %v541_v52 = vadd.f32 %v537_v49, %v517_v47 }
 0x22e   : > { %v516_v54 = vadd.f32 %v512_v50, %v492_v51 }
 0x22f   : > { %v587_v56 = vsub.f32 %v541_v52, %v579_v55  ;;  %v582_v7 = vpop.f32.mrf.mxu1 }
 0x230   : > { %v540_v57 = vadd.f32 %v536_v53, %v516_v54 }
 0x231   : > { %591 = vst [vmem:[%s1095_s8 + $0x10] sm:$0xff] %v587_v56  ;;  %v485_v59 = vpop.permute.xlu1 %484 }
 0x232   : > { %v586_v60 = vsub.f32 %v540_v57, %v576_v36  ;;  %v490_v61 = vmul.f32 %v485_v59, %v382_v58 }
 0x234   : > { %590 = vst [vmem:[%s1095_s8 + $0x8] sm:$0xff] %v586_v60  ;;  %v494_v0 = vadd.f32 %v490_v61, %v466_v62 }
 0x236   : > { %v518_v4 = vadd.f32 %v514_v2, %v494_v0 }
 0x23a   : > { %v533_v3 = vpop.permute.xlu1 %532 }
 0x23b   : > { %v538_v5 = vmul.f32 %v533_v3, %v440_v1 }
 0x23d   : > { %v542_v6 = vadd.f32 %v538_v5, %v518_v4 }
 0x23f   : > { %v588_v8 = vsub.f32 %v542_v6, %v582_v7 }
 0x241   : > { %592 = vst [vmem:[%s1095_s8 + $0x18] sm:$0xff] %v588_v8 }
 0x242   : > { %876 = shalt.err (!%p873_p8)
}
 0x243   : > { %s924_s5 = smov 128   ;;  %s925_s6 = smov 8  }
 0x244   : > { %735 = dma.vmem_to_hbm [thread:$0]  (%p989_p5), %s607_s13, 512, %s609_s14, %s594_s19, %s924_s5, %s924_s5, %s925_s6  }
 0x245 PF: > { %p747_p9 = scmp.ge.s32.totalorder %s915_s18, 2  ;;  %s623_s7 = sand.u32 1, %s903_s15  }
 0x246   : > { %s624_s8 = scalar_lea.sflag [#allocation4], %s623_s7 }
 0x247   : > { %p742_p10 = pnand %p747_p9, %p993_p6 }
 0x249   : > { %p743_p11 = pneg %p742_p10 }
 0x24b   : > { %898 = dma.done.wait (%p743_p11), %s624_s8, 512  }
 0x24c   : > { %900 = vsyncadd (%p743_p11), %s624_s8, 4294966784  ;;  %p15_p12 = scmp.ge.s32.totalorder %s976_s21, 4   ;;  %s1142_s15 = smov %s907_s16 }
 0x24d   : > { %s1143_s16 = smov %s911_s17  ;;  %s1144_s17 = smov %s987_s24 }
 0x24e   : > { %s1145_s18 = smov %s976_s21  ;;  %17 = sbr.rel (!%p15_p12) target bundleno = 4 (0x4), region = 76 }
 0x253   :  { %630 = vsyncpa [#allocation3], 1 }
 0x254   :  { %632 = vsyncpa [#allocation3 + $0x1], 1 }
 0x255   :  { %633 = vsyncpa [#allocation4], 1 }
 0x256   :  { %635 = vsyncpa [#allocation4 + $0x1], 1 }

</bundles_post_ra>
